<compile_context>
chip_gen: v6e
topology: v6e:2x2x1
jax: 0.10.0
libtpu: 0.0.40
codegen_flags: <defaults>
</compile_context>

<pallas_src>
import functools

import jax
import jax.numpy as jnp
from jax import lax
from jax.experimental import pallas as pl
from jax.experimental.pallas import tpu as pltpu

EXPANSION = 4
BN_EPS = 1e-5

LANE = 128                 # channel padding quantum (TPU lane width)
SUBLANE = 8                # row-tile quantum (f32 sublane packing)
ROW_TILE = 256             # target rows per block for slab kernels (256-512 ≈ HBM roofline)
DCOL_TILE = 2048           # target feature columns per block for similarity moments
VMEM_LIMIT = 32 * 1024 * 1024


# --------------------------------------------------------------------------- #
# static helpers
# --------------------------------------------------------------------------- #
def _round_up(x, q):
    return (x + q - 1) // q * q


def _pick_tile(total, target, quantum):
    """Largest multiple of `quantum` that divides `total` and is <= target."""
    t = min(total, target)
    t -= t % quantum
    while t >= quantum:
        if total % t == 0:
            return t
        t -= quantum
    return total  # single full block (always a legal block shape)


def _pad_last(x, to):
    pad = to - x.shape[-1]
    if pad == 0:
        return x
    return jnp.pad(x, [(0, 0)] * (x.ndim - 1) + [(0, pad)])


def _cparams(semantics):
    return pltpu.CompilerParams(dimension_semantics=semantics,
                                vmem_limit_bytes=VMEM_LIMIT)


# --------------------------------------------------------------------------- #
# Pallas kernels
# --------------------------------------------------------------------------- #
def _mm_bias_stats_kernel(*refs, pre_bn):
    """(optionally BN+ReLU on input) -> x @ w + b, plus per-channel sum/sumsq."""
    if pre_bn:
        x_ref, sc_ref, sh_ref, w_ref, b_ref, y_ref, sum_ref, sq_ref = refs
    else:
        x_ref, w_ref, b_ref, y_ref, sum_ref, sq_ref = refs

    x = x_ref[...]
    if pre_bn:  # fused BatchNorm (affine form) + ReLU on the input tile (f32 VPU)
        x = jnp.maximum(x * sc_ref[...] + sh_ref[...], 0.0)

    y = jnp.dot(x.astype(jnp.bfloat16), w_ref[...],
                preferred_element_type=jnp.float32) + b_ref[...]
    y_ref[...] = y

    @pl.when(pl.program_id(0) == 0)
    def _init():
        sum_ref[...] = jnp.zeros_like(sum_ref)
        sq_ref[...] = jnp.zeros_like(sq_ref)

    sum_ref[...] += jnp.sum(y, axis=0, keepdims=True)
    sq_ref[...] += jnp.sum(y * y, axis=0, keepdims=True)


def _conv3x3_stats_kernel(x_ref, w_ref, b_ref, y_ref, sum_ref, sq_ref,
                          *, stride, ho, wo):
    """3x3 conv for one sample: 9 shifted tap matmuls accumulated in f32
    (no im2col materialization), bias epilogue, fused per-channel stats."""
    cp = x_ref.shape[3]
    cop = w_ref.shape[3]
    acc = jnp.zeros((ho * wo, cop), jnp.float32)
    for kh in range(3):
        for kw in range(3):
            if stride == 1:
                patch = x_ref[0, kh:kh + ho, kw:kw + wo, :]
            else:
                patch = x_ref[0, pl.ds(kh, ho, stride=stride),
                              pl.ds(kw, wo, stride=stride), :]
            patch = patch.reshape(ho * wo, cp).astype(jnp.bfloat16)
            acc = acc + jnp.dot(patch, w_ref[kh, kw],
                                preferred_element_type=jnp.float32)
    y = acc + b_ref[...]
    y_ref[0] = y

    @pl.when(pl.program_id(0) == 0)
    def _init():
        sum_ref[...] = jnp.zeros_like(sum_ref)
        sq_ref[...] = jnp.zeros_like(sq_ref)

    sum_ref[...] += jnp.sum(y, axis=0, keepdims=True)
    sq_ref[...] += jnp.sum(y * y, axis=0, keepdims=True)


def _bn_relu_kernel(x_ref, sc_ref, sh_ref, y_ref):
    y_ref[...] = jnp.maximum(x_ref[...] * sc_ref[...] + sh_ref[...], 0.0)


def _bn_add_bn_relu_kernel(a_ref, sa_ref, ba_ref, b_ref, sb_ref, bb_ref, y_ref):
    # Fused BN(a) + BN(b) + residual add + ReLU (single slab pass).
    y_ref[...] = jnp.maximum(
        a_ref[...] * sa_ref[...] + ba_ref[...]
        + b_ref[...] * sb_ref[...] + bb_ref[...], 0.0)


def _sim_moments_kernel(x_ref, g_ref, s1_ref, s2_ref):
    """D-tiled accumulation of the raw Gram matrix and per-sample moments."""
    @pl.when(pl.program_id(0) == 0)
    def _init():
        g_ref[...] = jnp.zeros_like(g_ref)
        s1_ref[...] = jnp.zeros_like(s1_ref)
        s2_ref[...] = jnp.zeros_like(s2_ref)

    x = x_ref[...]                                            # (N, Dt) f32
    g_ref[...] += lax.dot_general(x, x, (((1,), (1,)), ((), ())),
                                  preferred_element_type=jnp.float32)
    s1_ref[...] += jnp.sum(x, axis=1, keepdims=True)
    s2_ref[...] += jnp.sum(x * x, axis=1, keepdims=True)


# --------------------------------------------------------------------------- #
# pallas_call wrappers
# --------------------------------------------------------------------------- #
def _matmul_bias_stats(x2d, w_bf16, bias, scale=None, shift=None):
    """x2d: (M, Kp) f32, w: (Kp, Np) bf16, bias/scale/shift: (1, *) f32.
    Returns (y (M, Np) f32, col_sum (1, Np), col_sqsum (1, Np))."""
    m, kp = x2d.shape
    np_ = w_bf16.shape[1]
    mt = _pick_tile(m, ROW_TILE, SUBLANE)
    pre_bn = scale is not None

    x_spec = pl.BlockSpec((mt, kp), lambda i: (i, 0))
    row_k = pl.BlockSpec((1, kp), lambda i: (0, 0))
    row_n = pl.BlockSpec((1, np_), lambda i: (0, 0))
    w_spec = pl.BlockSpec((kp, np_), lambda i: (0, 0))
    y_spec = pl.BlockSpec((mt, np_), lambda i: (i, 0))

    if pre_bn:
        in_specs = [x_spec, row_k, row_k, w_spec, row_n]
        args = (x2d, scale, shift, w_bf16, bias)
    else:
        in_specs = [x_spec, w_spec, row_n]
        args = (x2d, w_bf16, bias)

    # "arbitrary": the per-channel stats outputs are accumulators revisited
    # across the row-tile axis (on v7x one could split stats into a separate
    # "parallel" pass to use both TensorCores).
    return pl.pallas_call(
        functools.partial(_mm_bias_stats_kernel, pre_bn=pre_bn),
        grid=(m // mt,),
        in_specs=in_specs,
        out_specs=(y_spec, row_n, row_n),
        out_shape=(jax.ShapeDtypeStruct((m, np_), jnp.float32),
                   jax.ShapeDtypeStruct((1, np_), jnp.float32),
                   jax.ShapeDtypeStruct((1, np_), jnp.float32)),
        compiler_params=_cparams(("arbitrary",)),
    )(*args)


def _conv3x3_stats(x_nhwc, w_bf16, bias, stride):
    """x_nhwc: (N, H, W, Cp) f32 activation; w: (3, 3, Cp, Cop) bf16."""
    n, h, w, cp = x_nhwc.shape
    cop = w_bf16.shape[3]
    ho = (h - 1) // stride + 1
    wo = (w - 1) // stride + 1
    xp = jnp.pad(x_nhwc, ((0, 0), (1, 1), (1, 1), (0, 0)))   # spatial zero pad
    hp, wp = h + 2, w + 2

    y, csum, csq = pl.pallas_call(
        functools.partial(_conv3x3_stats_kernel, stride=stride, ho=ho, wo=wo),
        grid=(n,),
        in_specs=[pl.BlockSpec((1, hp, wp, cp), lambda i: (i, 0, 0, 0)),
                  pl.BlockSpec((3, 3, cp, cop), lambda i: (0, 0, 0, 0)),
                  pl.BlockSpec((1, cop), lambda i: (0, 0))],
        out_specs=(pl.BlockSpec((1, ho * wo, cop), lambda i: (i, 0, 0)),
                   pl.BlockSpec((1, cop), lambda i: (0, 0)),
                   pl.BlockSpec((1, cop), lambda i: (0, 0))),
        out_shape=(jax.ShapeDtypeStruct((n, ho * wo, cop), jnp.float32),
                   jax.ShapeDtypeStruct((1, cop), jnp.float32),
                   jax.ShapeDtypeStruct((1, cop), jnp.float32)),
        compiler_params=_cparams(("arbitrary",)),
    )(xp, w_bf16, bias)
    return y.reshape(n * ho * wo, cop), csum, csq, ho, wo


def _bn_relu(x2d, scale, shift):
    m, c = x2d.shape
    mt = _pick_tile(m, ROW_TILE, SUBLANE)
    return pl.pallas_call(
        _bn_relu_kernel,
        grid=(m // mt,),
        in_specs=[pl.BlockSpec((mt, c), lambda i: (i, 0)),
                  pl.BlockSpec((1, c), lambda i: (0, 0)),
                  pl.BlockSpec((1, c), lambda i: (0, 0))],
        out_specs=pl.BlockSpec((mt, c), lambda i: (i, 0)),
        out_shape=jax.ShapeDtypeStruct((m, c), jnp.float32),
        compiler_params=_cparams(("parallel",)),
    )(x2d, scale, shift)


def _bn_add_bn_relu(a2d, sa, ba, b2d, sb, bb):
    m, c = a2d.shape
    mt = _pick_tile(m, ROW_TILE, SUBLANE)
    tile = pl.BlockSpec((mt, c), lambda i: (i, 0))
    row = pl.BlockSpec((1, c), lambda i: (0, 0))
    return pl.pallas_call(
        _bn_add_bn_relu_kernel,
        grid=(m // mt,),
        in_specs=[tile, row, row, tile, row, row],
        out_specs=tile,
        out_shape=jax.ShapeDtypeStruct((m, c), jnp.float32),
        compiler_params=_cparams(("parallel",)),
    )(a2d, sa, ba, b2d, sb, bb)


def _similarity(x2d, n, d_true):
    """x2d: (N*Ho*Wo, Cp) conv output slab (pad channels are exact zeros).
    Gram/moments are accumulated over D-tiles in Pallas; the O(N^2) finalize
    runs as parameter-sized glue."""
    feat = x2d.reshape(n, -1)
    dp = feat.shape[1]
    dt = _pick_tile(dp, DCOL_TILE, LANE)
    gram, s1, s2 = pl.pallas_call(
        _sim_moments_kernel,
        grid=(dp // dt,),
        in_specs=[pl.BlockSpec((n, dt), lambda i: (0, i))],
        out_specs=(pl.BlockSpec((n, n), lambda i: (0, 0)),
                   pl.BlockSpec((n, 1), lambda i: (0, 0)),
                   pl.BlockSpec((n, 1), lambda i: (0, 0))),
        out_shape=(jax.ShapeDtypeStruct((n, n), jnp.float32),
                   jax.ShapeDtypeStruct((n, 1), jnp.float32),
                   jax.ShapeDtypeStruct((n, 1), jnp.float32)),
        compiler_params=_cparams(("arbitrary",)),
    )(feat)
    d = float(d_true)
    mean = s1 / d                                  # (N, 1)
    var = (s2 - d * mean * mean) / (d - 1.0)       # torch unbiased std
    std = jnp.sqrt(var)
    centered = gram - d * (mean * mean.T)          # (N, N)
    return centered / (std * std.T) / d


def _bn_affine(col_sum, col_sq, rows, gamma, beta):
    """Per-channel affine (scale, shift) from accumulated sum / sum-of-squares
    (training-mode BN: biased batch variance)."""
    r = float(rows)
    mean = col_sum / r
    var = jnp.maximum(col_sq / r - mean * mean, 0.0)
    scale = gamma * lax.rsqrt(var + BN_EPS)
    shift = beta - mean * scale
    return scale, shift


# --------------------------------------------------------------------------- #
# Bottleneck module
# --------------------------------------------------------------------------- #
def init_params(key, in_planes, planes, stride=1):
    ks = jax.random.split(key, 8)
    p = {
        "w1": jax.random.normal(ks[0], (in_planes, planes), jnp.float32) * 0.1,
        "b1": jax.random.normal(ks[1], (planes,), jnp.float32) * 0.1,
        "w2": jax.random.normal(ks[2], (3, 3, planes, planes), jnp.float32) * 0.1,
        "b2": jax.random.normal(ks[3], (planes,), jnp.float32) * 0.1,
        "w3": jax.random.normal(ks[4], (planes, EXPANSION * planes), jnp.float32) * 0.1,
        "b3": jax.random.normal(ks[5], (EXPANSION * planes,), jnp.float32) * 0.1,
        "g1": jnp.ones((planes,), jnp.float32),
        "bt1": jnp.zeros((planes,), jnp.float32),
        "g2": jnp.ones((planes,), jnp.float32),
        "bt2": jnp.zeros((planes,), jnp.float32),
        "g3": jnp.ones((EXPANSION * planes,), jnp.float32),
        "bt3": jnp.zeros((EXPANSION * planes,), jnp.float32),
    }
    if stride != 1 or in_planes != EXPANSION * planes:
        p["ws"] = jax.random.normal(ks[6], (in_planes, EXPANSION * planes), jnp.float32) * 0.1
        p["bs"] = jax.random.normal(ks[7], (EXPANSION * planes,), jnp.float32) * 0.1
        p["gs"] = jnp.ones((EXPANSION * planes,), jnp.float32)
        p["bts"] = jnp.zeros((EXPANSION * planes,), jnp.float32)
    return p


def bottleneck_forward(x_nchw, S, params, in_planes, planes, stride=1):
    """Mirrors Bottleneck.forward((x, S)). Returns (out_nchw, S + [...])."""
    f32, bf16 = jnp.float32, jnp.bfloat16
    n, _, h, w = x_nchw.shape
    c3_true = EXPANSION * planes
    cin_p = _round_up(in_planes, LANE)
    c1_p = _round_up(planes, LANE)
    c3_p = _round_up(c3_true, LANE)
    has_shortcut = (stride != 1) or (in_planes != c3_true)

    # Lane-dense (128-padded) channel layout; weights pre-cast to bf16 for the MXU.
    x_nhwc = _pad_last(jnp.transpose(x_nchw, (0, 2, 3, 1)).astype(f32), cin_p)
    w1 = jnp.pad(params["w1"], ((0, cin_p - in_planes), (0, c1_p - planes))).astype(bf16)
    b1 = _pad_last(params["b1"][None, :], c1_p)
    g1 = _pad_last(params["g1"][None, :], c1_p)
    bt1 = _pad_last(params["bt1"][None, :], c1_p)
    w2 = jnp.pad(params["w2"], ((0, 0), (0, 0),
                                (0, c1_p - planes), (0, c1_p - planes))).astype(bf16)
    b2 = _pad_last(params["b2"][None, :], c1_p)
    g2 = _pad_last(params["g2"][None, :], c1_p)
    bt2 = _pad_last(params["bt2"][None, :], c1_p)
    w3 = jnp.pad(params["w3"], ((0, c1_p - planes), (0, c3_p - c3_true))).astype(bf16)
    b3 = _pad_last(params["b3"][None, :], c3_p)
    g3 = _pad_last(params["g3"][None, :], c3_p)
    bt3 = _pad_last(params["bt3"][None, :], c3_p)

    m_in = n * h * w
    x2d = x_nhwc.reshape(m_in, cin_p)

    # conv1 (1x1) + fused per-channel stats for BN1
    out1, c1sum, c1sq = _matmul_bias_stats(x2d, w1, b1)
    sim1 = _similarity(out1, n, h * w * planes)
    sc1, sh1 = _bn_affine(c1sum, c1sq, m_in, g1, bt1)

    # BN1 + ReLU (single fused pass), then 3x3 conv (+ fused stats for BN2)
    act1 = _bn_relu(out1, sc1, sh1).reshape(n, h, w, c1_p)
    out2, c2sum, c2sq, ho, wo = _conv3x3_stats(act1, w2, b2, stride)
    m_out = n * ho * wo
    sim2 = _similarity(out2, n, ho * wo * planes)
    sc2, sh2 = _bn_affine(c2sum, c2sq, m_out, g2, bt2)

    # conv3 (1x1) with BN2+ReLU fused onto its input (+ fused stats for BN3)
    out3, c3sum, c3sq = _matmul_bias_stats(out2, w3, b3, scale=sc2, shift=sh2)
    sim3 = _similarity(out3, n, ho * wo * c3_true)
    sc3, sh3 = _bn_affine(c3sum, c3sq, m_out, g3, bt3)

    if has_shortcut:
        ws = jnp.pad(params["ws"], ((0, cin_p - in_planes), (0, c3_p - c3_true))).astype(bf16)
        bs = _pad_last(params["bs"][None, :], c3_p)
        gs = _pad_last(params["gs"][None, :], c3_p)
        bts = _pad_last(params["bts"][None, :], c3_p)
        xs2d = x_nhwc[:, ::stride, ::stride, :].reshape(m_out, cin_p)
        outsc, cssum, cssq = _matmul_bias_stats(xs2d, ws, bs)
        sim_sc = _similarity(outsc, n, ho * wo * c3_true)
        scs, shs = _bn_affine(cssum, cssq, m_out, gs, bts)
        # BN3 + shortcut-BN + residual add + ReLU fused into one slab pass.
        out = _bn_add_bn_relu(out3, sc3, sh3, outsc, scs, shs)
        sims = S + [sim1, sim2, sim3, sim_sc]
    else:
        ones = jnp.ones((1, c3_p), f32)
        zeros = jnp.zeros((1, c3_p), f32)
        out = _bn_add_bn_relu(out3, sc3, sh3, x2d, ones, zeros)
        sims = S + [sim1, sim2, sim3]

    out_nhwc = out.reshape(n, ho, wo, c3_p)[..., :c3_true]
    return jnp.transpose(out_nhwc, (0, 3, 1, 2)), sims


# --------------------------------------------------------------------------- #
# pure-JAX reference (same math, including bf16 rounding at the matmuls)
# --------------------------------------------------------------------------- #
def _ref_forward(x_nchw, S, p, in_planes, planes, stride):
    f32, bf16 = jnp.float32, jnp.bfloat16
    x = jnp.transpose(x_nchw, (0, 2, 3, 1)).astype(f32)

    def mm(a, wt, b):
        return jnp.dot(a.astype(bf16), wt.astype(bf16),
                       preferred_element_type=f32) + b

    def conv1(xi, wt, b, s=1):
        if s != 1:
            xi = xi[:, ::s, ::s, :]
        nn_, hh, ww, cc = xi.shape
        return mm(xi.reshape(-1, cc), wt, b).reshape(nn_, hh, ww, -1)

    def conv3(xi, wt, b, s):
        y = lax.conv_general_dilated(
            xi.astype(bf16), wt.astype(bf16), window_strides=(s, s),
            padding=((1, 1), (1, 1)),
            dimension_numbers=("NHWC", "HWIO", "NHWC"),
            preferred_element_type=f32)
        return y + b

    def bn(xi, g, b, relu):
        mean = jnp.mean(xi, axis=(0, 1, 2))
        var = jnp.var(xi, axis=(0, 1, 2))
        y = (xi - mean) * lax.rsqrt(var + BN_EPS) * g + b
        return jnp.maximum(y, 0.0) if relu else y

    def sim(xi):
        nn_ = xi.shape[0]
        xf = xi.reshape(nn_, -1)
        d = xf.shape[1]
        mu = jnp.mean(xf, axis=1, keepdims=True)
        sd = jnp.sqrt(jnp.sum((xf - mu) ** 2, axis=1, keepdims=True) / (d - 1))
        xs = (xf - mu) / sd
        return (xs @ xs.T) / d

    out1 = conv1(x, p["w1"], p["b1"])
    s1 = sim(out1)
    a1 = bn(out1, p["g1"], p["bt1"], True)
    out2 = conv3(a1, p["w2"], p["b2"], stride)
    s2 = sim(out2)
    a2 = bn(out2, p["g2"], p["bt2"], True)
    out3 = conv1(a2, p["w3"], p["b3"])
    s3 = sim(out3)
    o3 = bn(out3, p["g3"], p["bt3"], False)
    if stride != 1 or in_planes != EXPANSION * planes:
        sc = conv1(x, p["ws"], p["bs"], stride)
        ss = sim(sc)
        scb = bn(sc, p["gs"], p["bts"], False)
        out = jnp.maximum(o3 + scb, 0.0)
        sims = S + [s1, s2, s3, ss]
    else:
        out = jnp.maximum(o3 + x, 0.0)
        sims = S + [s1, s2, s3]
    return jnp.transpose(out, (0, 3, 1, 2)), sims


# --------------------------------------------------------------------------- #
if __name__ == "__main__":
    key = jax.random.PRNGKey(0)
    kx, kp = jax.random.split(key)

    N, in_planes, planes, H, W, stride = 2, 4, 4, 16, 16, 1
    x = jax.random.normal(kx, (N, in_planes, H, W), jnp.float32)
    params = init_params(kp, in_planes, planes, stride)

    out, sims = bottleneck_forward(x, [], params, in_planes, planes, stride)
    out = jax.block_until_ready(out)
    sims = [jax.block_until_ready(s) for s in sims]

    assert out.shape == (N, EXPANSION * planes, H // stride, W // stride)
    assert len(sims) == 4 and all(s.shape == (N, N) for s in sims)

    # Numerical check against a pure-JAX reference using the same bf16 matmul
    # rounding (all other math in f32).
    ref_out, ref_sims = _ref_forward(x, [], params, in_planes, planes, stride)
    assert jnp.allclose(out, ref_out, rtol=2e-2, atol=2e-2)
    for s_k, s_r in zip(sims, ref_sims):
        assert jnp.allclose(s_k, s_r, rtol=2e-2, atol=2e-2)

    print("KERNEL_OK")
</pallas_src>

<mosaic_0001>
module attributes {stable_mosaic.version = 11 : i64} {
  func.func @_mm_bias_stats_kernel(%arg0: i32, %arg1: memref<256x128xf32, #tpu.memory_space<vmem>>, %arg2: memref<128x128xbf16, #tpu.memory_space<vmem>>, %arg3: memref<1x128xf32, #tpu.memory_space<vmem>>, %arg4: memref<256x128xf32, #tpu.memory_space<vmem>>, %arg5: memref<1x128xf32, #tpu.memory_space<vmem>>, %arg6: memref<1x128xf32, #tpu.memory_space<vmem>>) attributes {dimension_semantics = [#tpu.dimension_semantics<arbitrary>], iteration_bounds = array<i64: 2>, scalar_prefetch = 0 : i64, scratch_operands = 0 : i64, tpu.core_type = #tpu.core_type<tc>, window_params = [{transform_indices = @transform_0, window_bounds = array<i64: 256, 128>}, {pipeline_mode = #tpu.pipeline_mode<synchronous>, transform_indices = @transform_1, window_bounds = array<i64: 128, 128>}, {pipeline_mode = #tpu.pipeline_mode<synchronous>, transform_indices = @transform_2, window_bounds = array<i64: 1, 128>}, {transform_indices = @transform_3, window_bounds = array<i64: 256, 128>}, {pipeline_mode = #tpu.pipeline_mode<synchronous>, transform_indices = @transform_4, window_bounds = array<i64: 1, 128>}, {pipeline_mode = #tpu.pipeline_mode<synchronous>, transform_indices = @transform_5, window_bounds = array<i64: 1, 128>}]} {
    %c0 = arith.constant 0 : index
    %c0_0 = arith.constant 0 : index
    %0 = vector.load %arg1[%c0, %c0_0] : memref<256x128xf32, #tpu.memory_space<vmem>>, vector<256x128xf32>
    %1 = arith.truncf %0 : vector<256x128xf32> to vector<256x128xbf16>
    %c0_1 = arith.constant 0 : index
    %c0_2 = arith.constant 0 : index
    %2 = vector.load %arg2[%c0_1, %c0_2] : memref<128x128xbf16, #tpu.memory_space<vmem>>, vector<128x128xbf16>
    %cst = arith.constant dense<0.000000e+00> : vector<256x128xf32>
    %3 = tpu.matmul %1, %2, %cst {dimension_numbers = #tpu.dot_dimension_numbers<[1], [0], [0], [1], [0, 0, 1, 1], [], []>} : vector<256x128xbf16>, vector<128x128xbf16>, vector<256x128xf32> -> vector<256x128xf32>
    %c0_3 = arith.constant 0 : index
    %c0_4 = arith.constant 0 : index
    %4 = vector.load %arg3[%c0_3, %c0_4] : memref<1x128xf32, #tpu.memory_space<vmem>>, vector<1x128xf32>
    %5 = vector.broadcast %4 : vector<1x128xf32> to vector<256x128xf32>
    %6 = arith.addf %3, %5 : vector<256x128xf32>
    %c0_5 = arith.constant 0 : index
    %c0_6 = arith.constant 0 : index
    %7 = vector.load %arg4[%c0_5, %c0_6] : memref<256x128xf32, #tpu.memory_space<vmem>>, vector<256x128xf32>
    tpu.vector_store %arg4[%c0_5, %c0_6], %6 {strides = array<i32>} : memref<256x128xf32, #tpu.memory_space<vmem>>, vector<256x128xf32>,
    %c0_i32 = arith.constant 0 : i32
    %8 = arith.cmpi eq, %arg0, %c0_i32 : i32
    %9 = arith.extui %8 : i1 to i32
    %c0_i32_7 = arith.constant 0 : i32
    %10 = arith.cmpi ne, %9, %c0_i32_7 : i32
    scf.if %10 {
      %cst_18 = arith.constant 0.000000e+00 : f32
      %22 = vector.broadcast %cst_18 : f32 to vector<1x128xf32>
      %c0_19 = arith.constant 0 : index
      %c0_20 = arith.constant 0 : index
      %23 = vector.load %arg5[%c0_19, %c0_20] : memref<1x128xf32, #tpu.memory_space<vmem>>, vector<1x128xf32>
      tpu.vector_store %arg5[%c0_19, %c0_20], %22 {strides = array<i32>} : memref<1x128xf32, #tpu.memory_space<vmem>>, vector<1x128xf32>,
      %cst_21 = arith.constant 0.000000e+00 : f32
      %24 = vector.broadcast %cst_21 : f32 to vector<1x128xf32>
      %c0_22 = arith.constant 0 : index
      %c0_23 = arith.constant 0 : index
      %25 = vector.load %arg6[%c0_22, %c0_23] : memref<1x128xf32, #tpu.memory_space<vmem>>, vector<1x128xf32>
      tpu.vector_store %arg6[%c0_22, %c0_23], %24 {strides = array<i32>} : memref<1x128xf32, #tpu.memory_space<vmem>>, vector<1x128xf32>,
    } else {
    }
    %c0_8 = arith.constant 0 : index
    %c0_9 = arith.constant 0 : index
    %11 = vector.load %arg5[%c0_8, %c0_9] : memref<1x128xf32, #tpu.memory_space<vmem>>, vector<1x128xf32>
    %cst_10 = arith.constant dense<0.000000e+00> : vector<128xf32>
    %12 = vector.multi_reduction <add>, %6, %cst_10 [0] : vector<256x128xf32> to vector<128xf32>
    %13 = vector.shape_cast %12 : vector<128xf32> to vector<1x128xf32>
    %14 = arith.addf %11, %13 : vector<1x128xf32>
    %c0_11 = arith.constant 0 : index
    %c0_12 = arith.constant 0 : index
    %15 = vector.load %arg5[%c0_11, %c0_12] : memref<1x128xf32, #tpu.memory_space<vmem>>, vector<1x128xf32>
    tpu.vector_store %arg5[%c0_11, %c0_12], %14 {strides = array<i32>} : memref<1x128xf32, #tpu.memory_space<vmem>>, vector<1x128xf32>,
    %c0_13 = arith.constant 0 : index
    %c0_14 = arith.constant 0 : index
    %16 = vector.load %arg6[%c0_13, %c0_14] : memref<1x128xf32, #tpu.memory_space<vmem>>, vector<1x128xf32>
    %17 = arith.mulf %6, %6 : vector<256x128xf32>
    %cst_15 = arith.constant dense<0.000000e+00> : vector<128xf32>
    %18 = vector.multi_reduction <add>, %17, %cst_15 [0] : vector<256x128xf32> to vector<128xf32>
    %19 = vector.shape_cast %18 : vector<128xf32> to vector<1x128xf32>
    %20 = arith.addf %16, %19 : vector<1x128xf32>
    %c0_16 = arith.constant 0 : index
    %c0_17 = arith.constant 0 : index
    %21 = vector.load %arg6[%c0_16, %c0_17] : memref<1x128xf32, #tpu.memory_space<vmem>>, vector<1x128xf32>
    tpu.vector_store %arg6[%c0_16, %c0_17], %20 {strides = array<i32>} : memref<1x128xf32, #tpu.memory_space<vmem>>, vector<1x128xf32>,
    return
  }
  func.func @transform_0(%arg0: i32) -> (i32, i32) {
    %c0_i32 = arith.constant 0 : i32
    %c0_i32_0 = arith.constant 0 : i32
    return %arg0, %c0_i32 : i32, i32
  }
  func.func @transform_1(%arg0: i32) -> (i32, i32) {
    %c0_i32 = arith.constant 0 : i32
    %c0_i32_0 = arith.constant 0 : i32
    %c0_i32_1 = arith.constant 0 : i32
    return %c0_i32, %c0_i32_0 : i32, i32
  }
  func.func @transform_2(%arg0: i32) -> (i32, i32) {
    %c0_i32 = arith.constant 0 : i32
    %c0_i32_0 = arith.constant 0 : i32
    %c0_i32_1 = arith.constant 0 : i32
    return %c0_i32, %c0_i32_0 : i32, i32
  }
  func.func @transform_3(%arg0: i32) -> (i32, i32) {
    %c0_i32 = arith.constant 0 : i32
    %c0_i32_0 = arith.constant 0 : i32
    return %arg0, %c0_i32 : i32, i32
  }
  func.func @transform_4(%arg0: i32) -> (i32, i32) {
    %c0_i32 = arith.constant 0 : i32
    %c0_i32_0 = arith.constant 0 : i32
    %c0_i32_1 = arith.constant 0 : i32
    return %c0_i32, %c0_i32_0 : i32, i32
  }
  func.func @transform_5(%arg0: i32) -> (i32, i32) {
    %c0_i32 = arith.constant 0 : i32
    %c0_i32_0 = arith.constant 0 : i32
    %c0_i32_1 = arith.constant 0 : i32
    return %c0_i32, %c0_i32_0 : i32, i32
  }
}

</mosaic_0001>

<bundles_post_ra>
// kernel: tpu_custom_call.1
= control target key start
LH: loop header
LB: loop body
LE: loop exit
PB: predicated region body
PF: predicated region fallthrough
CT: control target
= control target key end

     0   :  { %11 = vsyncpa [#allocation3], 0  ;;  %s1751_s0 = inlined_call_operand.hbm [shape: f32[512,128], index: 0, kind: input, shape index: {}]   ;;  %s1752_s1 = inlined_call_operand.hbm [shape: bf16[128,128], index: 1, kind: input, shape index: {}]   ;;  %s1753_s2 = inlined_call_operand.vmem [shape: f32[1,128], index: 2, kind: input, shape index: {}]   ;;  %s1754_s3 = inlined_call_operand.hbm [shape: f32[512,128], index: 3, kind: output, shape index: {0}]   ;;  %s1755_s4 = inlined_call_operand.hbm [shape: f32[1,128], index: 4, kind: output, shape index: {1}]   ;;  %s1756_s5 = inlined_call_operand.hbm [shape: f32[1,128], index: 5, kind: output, shape index: {2}]  }
   0x1   :  { %13 = vsyncpa [#allocation3 + $0x1], 0 }
   0x2   :  { %14 = vsyncpa [#allocation6], 0 }
   0x3   :  { %15 = vsyncpa [#allocation4], 0 }
   0x4   :  { %17 = vsyncpa [#allocation4 + $0x1], 0 }
   0x5   :  { %18 = vsyncpa [#allocation9], 0  ;;  %s1251_s18 = smov 0   ;;  %s1253_s19 = smov 0  }
   0x6   :  { %s1255_s20 = smov 0   ;;  %s1257_s21 = smov 0  }
   0x7 LB: > { %s1272_s22 = sadd.s32 4294967295, %s1207_s21   ;;  %s827_s23 = sadd.s32 4294967294, %s1207_s21   ;;  %s1207_s21 = sphi %s1257_s21, %s1785_s21   ;;  %s1203_s20 = sphi %s1255_s20, %s1784_s20   ;;  %s1199_s19 = sphi %s1253_s19, %s1783_s19   ;;  %s1195_s18 = sphi %s1251_s18, %s1782_s18  }
   0x8   : > { %p44_p0 = scmp.ne.s32.totalorder %s1199_s19, %s1195_s18  ;;  %p1757_p1 = scmp.eq.s32.totalorder %s1272_s22, 0 }
   0x9   : > { %p116_p3 = scmp.eq.s32.totalorder %s827_s23, 1  ;;  %p828_p5 = scmp.ge.s32.totalorder %s1207_s21, 1 }
   0xa   : > { %p1281_p4 = por %p1757_p1, %p44_p0  ;;  %p165_p7 = scmp.lt.s32.totalorder %s1207_s21, 3 }
   0xb   : > { %p1286_p6 = por %p116_p3, %p44_p0  ;;  %s1209_s27 = smov [#allocation5]  }
   0xc   : > { %s1761_s24 = scalar_select %p1281_p4, 1, 0 }
   0xd   : > { %s1762_s25 = scalar_select %p1286_p6, 1, 0 }
   0xe   : > { %p1292_p9 = pnand %p828_p5, %p165_p7  ;;  %s177_s28 = sshll.u32 %s1209_s27, 4  ;;  %s178_s28 = int_to_ptr.vmem [resolvable:$true] %s177_s28 }
   0xf   : > { %s1306_s30 = sadd.s32 1, %s1207_s21   ;;  %s31_s6 = sadd.s32 1, %s1203_s20 }
  0x10   : > { %s1763_s26 = scalar_select %p1292_p9, 1, 0 }
  0x11   : > { %p963_p10 = pneg %p1292_p9  ;;  %s28_s7 = ssub.s32 %s1207_s21, %s1306_s30 }
  0x12   : > { %s1044_s8 = scalar_lea.vmem %s178_s28, 1024  ;;  %p1052_p7 = scmp.lt.s32.totalorder %s178_s28, %s178_s28 }
  0x13   : > { %p1301_p12 = pnand %p963_p10, %p1757_p1  ;;  %p1045_p0 = scmp.ne.s32.totalorder %s178_s28, %s1044_s8 }
  0x14   : > { %p1053_p8 = scmp.lt.s32.totalorder %s1044_s8, %s1044_s8 }
  0x15   : > { %p1035_p13 = pneg %p1301_p12 }
  0x16   : > { %p1054_p11 = por %p1053_p8, %p1052_p7 }
  0x17   : > { %p1047_p3 = pnand %p1045_p0, %p1035_p13 }
  0x19   : > { %p1048_p5 = pneg %p1047_p3 }
  0x1b   : > { %p1055_p2 = pnand %p1054_p11, %p1048_p5 }
  0x1d   : > { %1058 = shalt.err (!%p1055_p2)
}
  0x1e   : > { %s1210_s9 = smov 64   ;;  %s1211_s10 = smov 4  }
  0x1f   : > { %966 = dma.hbm_to_vmem [thread:$0]  (!%p1301_p12), %s1752_s1, 1024, %s178_s28, [#allocation6], %s1210_s9, %s1210_s9, %s1211_s10  }
  0x20   : > { %p29_p10 = scmp.eq.s32.totalorder %s28_s7, 0  ;;  %p38_p8 = scmp.ne.s32.totalorder %s1203_s20, %s1199_s19 }
  0x21   : > { %p39_p11 = scmp.eq.s32.totalorder %s1207_s21, 0  ;;  %p976_p2 = scmp.lt.s32.totalorder %s1207_s21, 2 }
  0x22   : > { %s1323_s13 = scalar_select %p29_p10, %s1203_s20, %s31_s6  }
  0x23   : > { %p40_p13 = por %p39_p11, %p38_p8  ;;  %p1765_p0 = scmp.eq.s32.totalorder %s1272_s22, 1 }
  0x24   : > { %s194_s15 = sand.u32 1, %s1203_s20   ;;  %s857_s16 = sshll.u32 %s1207_s21, 12 }
  0x25   : > { %p1327_p3 = por %p1765_p0, %p38_p8  ;;  %s831_s17 = sshll.u32 %s194_s15, 8 }
  0x26   : > { %s1336_s29 = scalar_lea.hbm %s1751_s0, %s857_s16  ;;  %s198_s28 = scalar_lea.vmem [#allocation2], %s831_s17 }
  0x27   : > { %s1766_s14 = scalar_select %p1327_p3, 1, 0 }
  0x28   : > { %s205_s6 = sshll.u32 %s198_s28, 4  ;;  %p1338_p12 = pnand %p976_p2, %p40_p13  ;;  %s1342_s6 = int_to_ptr.vmem [resolvable:$true] %s205_s6 }
  0x29   : > { %s1344_s8 = scalar_lea.sflag [#allocation3], %s194_s15  ;;  %s1059_s9 = scalar_lea.hbm %s1336_s29, 4096 }
  0x2a   : > { %p1060_p5 = scmp.ne.s32.totalorder %s1336_s29, %s1059_s9  ;;  %p1061_p7 = pneg %p1338_p12 }
  0x2b   : > { %s1064_s12 = scalar_lea.hbm %s1751_s0, 8192  ;;  %p1065_p11 = scmp.lt.s32.totalorder %s1336_s29, %s1751_s0 }
  0x2c   : > { %p1062_p10 = pnand %p1061_p7, %p1060_p5  ;;  %p1066_p2 = scmp.lt.s32.totalorder %s1064_s12, %s1059_s9 }
  0x2e   : > { %p1063_p8 = pneg %p1062_p10  ;;  %p1067_p13 = por %p1066_p2, %p1065_p11 }
  0x30   : > { %p1068_p0 = pnand %p1067_p13, %p1063_p8 }
  0x32   : > { %1071 = shalt.err (!%p1068_p0)
}
  0x33   : > { %s1072_s15 = scalar_lea.vmem %s1342_s6, 4096  ;;  %s1212_s23 = smov [#allocation2]  }
  0x34   : > { %p1073_p1 = scmp.ne.s32.totalorder %s1342_s6, %s1072_s15  ;;  %s1077_s27 = sshll.u32 %s1212_s23, 4  ;;  %s1078_s27 = int_to_ptr.vmem [resolvable:$false] %s1077_s27 }
  0x35   : > { %s1079_s28 = scalar_lea.vmem %s1078_s27, 8192  ;;  %p1080_p10 = scmp.lt.s32.totalorder %s1342_s6, %s1078_s27 }
  0x36   : > { %p1075_p6 = pnand %p1073_p1, %p1061_p7  ;;  %p1081_p3 = scmp.lt.s32.totalorder %s1079_s28, %s1072_s15 }
  0x38   : > { %p1076_p5 = pneg %p1075_p6  ;;  %p1082_p4 = por %p1081_p3, %p1080_p10 }
  0x3a   : > { %p1083_p9 = pnand %p1082_p4, %p1076_p5 }
  0x3c   : > { %1086 = shalt.err (!%p1083_p9)
}
  0x3d   : > { %s1213_s9 = smov 128   ;;  %s1214_s10 = smov 8  }
  0x3e   : > { %970 = dma.hbm_to_vmem [thread:$0]  (!%p1338_p12), %s1336_s29, 4096, %s1342_s6, %s1344_s8, %s1213_s9, %s1213_s9, %s1214_s10  }
  0x3f   : > { %p1768_p1 = scmp.ne.s32.totalorder %s1763_s26, 0 }
  0x40   : > { %s1368_s11 = sand.u32 (!%p1768_p1), 1, %s1199_s19   ;;  %p1769_p4 = scmp.ne.s32.totalorder (!%p1768_p1), %s1761_s24, 0 }
  0x41   : > { %217 = sbr.rel (%p1768_p1) target bundleno = 447 (0x1bf), region = 32  ;;  %s835_s12 = sshll.u32 (!%p1768_p1), %s1368_s11, 8 }
  0x42   : > { %s220_s16 = scalar_lea.sflag (!%p1768_p1), [#allocation3], %s1368_s11  ;;  %s1374_s17 = scalar_lea.vmem (!%p1768_p1), [#allocation2], %s835_s12 }
  0x46   : > { %1178 = dma.done.wait (%p1769_p4), %s220_s16, 4096  }
  0x47   : > { %1180 = vsyncadd (%p1769_p4), %s220_s16, 4294963200  ;;  %p1770_p6 = scmp.eq.s32.totalorder %s1272_s22, 0 }
  0x49   : > { %1182 = dma.done.wait (%p1770_p6), [#allocation6], 1024   ;;  %p1771_p9 = pmov %p1770_p6 }
  0x4a   : > { %v1025_v0 = vld [vmem:[#allocation5 + $0x38] sm:$0xff]   ;;  %v1026_v1 = vld [vmem:[#allocation5 + $0x30] sm:$0xff]   ;;  %v1027_v2 = vld [vmem:[#allocation5 + $0x28] sm:$0xff]   ;;  %s1429_s29 = scalar_lea.vmem [#allocation7], %s835_s12  ;;  %p1772_p3 = scmp.ne.s32.totalorder %s1272_s22, 0 }
  0x4b   : > { %1184 = vsyncadd (%p1771_p9), [#allocation6], 4294966272  ;;  %883 = vmatprep.subr.bf16.mxu0 %v1025_v0  ;;  %931 = vmatprep.subr.bf16.mxu1 %v1025_v0  ;;  %v1028_v3 = vld [vmem:[#allocation5 + $0x20] sm:$0xff]   ;;  %v258_v5 = vld [vmem:[%s1374_s17 + $0x8] sm:$0xff] }
  0x4c   : > { %884 = vmatpush3.bf16.msra.mxu0 %v1025_v0  ;;  %939 = vmatpush3.bf16.msra.mxu1 %v1025_v0  ;;  %v257_v4 = vld [vmem:[%s1374_s17] sm:$0xff]  ;;  %v274_v8 = vld [vmem:[%s1374_s17 + $0x88] sm:$0xff]  ;;  %v1029_v10 = vld [vmem:[#allocation5 + $0x18] sm:$0xff]  }
  0x4d   : > { %885 = vmatprep.subr.bf16.mxu0 %v1026_v1  ;;  %932 = vmatprep.subr.bf16.mxu1 %v1026_v1  ;;  %v273_v6 = vld [vmem:[%s1374_s17 + $0x80] sm:$0xff]  ;;  %v289_v7 = vpack.c.bf16 %v258_v5, %v257_v4  ;;  %v1030_v11 = vld [vmem:[#allocation5 + $0x10] sm:$0xff]   ;;  %v1031_v12 = vld [vmem:[#allocation5 + $0x8] sm:$0xff]  }
  0x4e   : > { %v297_v9 = vpack.c.bf16 %v274_v8, %v273_v6  ;;  %v1032_v13 = vld [vmem:[#allocation5] sm:$0xff]   ;;  %v259_v14 = vld [vmem:[%s1374_s17 + $0x10] sm:$0xff]  ;;  %v260_v15 = vld [vmem:[%s1374_s17 + $0x18] sm:$0xff] }
  0x4f   : > { %899 = vmatprep.mubr.bf16.mxu0 %v289_v7  ;;  %v275_v16 = vld [vmem:[%s1374_s17 + $0x90] sm:$0xff]  ;;  %v276_v17 = vld [vmem:[%s1374_s17 + $0x98] sm:$0xff]  ;;  %v261_v18 = vld [vmem:[%s1374_s17 + $0x20] sm:$0xff]  ;;  %v290_v22 = vpack.c.bf16 %v260_v15, %v259_v14 }
  0x50   : > { %886 = vmatpush3.bf16.msra.mxu0 %v1026_v1  ;;  %940 = vmatpush3.bf16.msra.mxu1 %v1026_v1  ;;  %v262_v19 = vld [vmem:[%s1374_s17 + $0x28] sm:$0xff]  ;;  %v277_v20 = vld [vmem:[%s1374_s17 + $0xa0] sm:$0xff]  ;;  %v298_v23 = vpack.c.bf16 %v276_v17, %v275_v16  ;;  %v263_v26 = vld [vmem:[%s1374_s17 + $0x30] sm:$0xff] }
  0x51   : > { %887 = vmatprep.subr.bf16.mxu0 %v1027_v2  ;;  %933 = vmatprep.subr.bf16.mxu1 %v1027_v2  ;;  %v278_v21 = vld [vmem:[%s1374_s17 + $0xa8] sm:$0xff]  ;;  %v291_v24 = vpack.c.bf16 %v262_v19, %v261_v18  ;;  %v264_v27 = vld [vmem:[%s1374_s17 + $0x38] sm:$0xff]  ;;  %v279_v28 = vld [vmem:[%s1374_s17 + $0xb0] sm:$0xff] }
  0x52   : > { %915 = vmatprep.mubr.bf16.mxu1 %v297_v9  ;;  %v299_v25 = vpack.c.bf16 %v278_v21, %v277_v20  ;;  %v280_v29 = vld [vmem:[%s1374_s17 + $0xb8] sm:$0xff]  ;;  %v265_v30 = vld [vmem:[%s1374_s17 + $0x40] sm:$0xff]  ;;  %v266_v31 = vld [vmem:[%s1374_s17 + $0x48] sm:$0xff]  ;;  %v292_v34 = vpack.c.bf16 %v264_v27, %v263_v26 }
  0x53   : > { %v281_v32 = vld [vmem:[%s1374_s17 + $0xc0] sm:$0xff]  ;;  %v282_v33 = vld [vmem:[%s1374_s17 + $0xc8] sm:$0xff]  ;;  %v300_v35 = vpack.c.bf16 %v280_v29, %v279_v28  ;;  %v293_v36 = vpack.c.bf16 %v266_v31, %v265_v30  ;;  %v267_v38 = vld [vmem:[%s1374_s17 + $0x50] sm:$0xff] }
  0x54   : > { %888 = vmatpush3.bf16.msra.mxu0 %v1027_v2  ;;  %941 = vmatpush3.bf16.msra.mxu1 %v1027_v2  ;;  %v301_v37 = vpack.c.bf16 %v282_v33, %v281_v32  ;;  %v268_v39 = vld [vmem:[%s1374_s17 + $0x58] sm:$0xff]  ;;  %v283_v40 = vld [vmem:[%s1374_s17 + $0xd0] sm:$0xff]  ;;  %v269_v42 = vld [vmem:[%s1374_s17 + $0x60] sm:$0xff] }
  0x55   : > { %889 = vmatprep.subr.bf16.mxu0 %v1028_v3  ;;  %934 = vmatprep.subr.bf16.mxu1 %v1028_v3  ;;  %v284_v41 = vld [vmem:[%s1374_s17 + $0xd8] sm:$0xff]  ;;  %v270_v43 = vld [vmem:[%s1374_s17 + $0x68] sm:$0xff]  ;;  %v285_v44 = vld [vmem:[%s1374_s17 + $0xe0] sm:$0xff]  ;;  %v294_v46 = vpack.c.bf16 %v268_v39, %v267_v38 }
  0x56   : > { %v286_v45 = vld [vmem:[%s1374_s17 + $0xe8] sm:$0xff]  ;;  %v302_v47 = vpack.c.bf16 %v284_v41, %v283_v40  ;;  %v295_v48 = vpack.c.bf16 %v270_v43, %v269_v42  ;;  %v271_v50 = vld [vmem:[%s1374_s17 + $0x70] sm:$0xff]  ;;  %v272_v51 = vld [vmem:[%s1374_s17 + $0x78] sm:$0xff] }
  0x57   : > { %v303_v49 = vpack.c.bf16 %v286_v45, %v285_v44  ;;  %v287_v52 = vld [vmem:[%s1374_s17 + $0xf0] sm:$0xff]  ;;  %v288_v53 = vld [vmem:[%s1374_s17 + $0xf8] sm:$0xff]  ;;  %v296_v54 = vpack.c.bf16 %v272_v51, %v271_v50  ;;  %v1419_v56 = vld [vmem:[%s1753_s2] ss:$0 sm:$0xff] }
  0x58   : > { %890 = vmatpush3.bf16.msra.mxu0 %v1028_v3  ;;  %942 = vmatpush3.bf16.msra.mxu1 %v1028_v3  ;;  %v304_v55 = vpack.c.bf16 %v288_v53, %v287_v52 }
  0x59   : > { %891 = vmatprep.subr.bf16.mxu0 %v1029_v10  ;;  %935 = vmatprep.subr.bf16.mxu1 %v1029_v10 }
  0x5c   : > { %892 = vmatpush3.bf16.msra.mxu0 %v1029_v10  ;;  %943 = vmatpush3.bf16.msra.mxu1 %v1029_v10 }
  0x5d   : > { %893 = vmatprep.subr.bf16.mxu0 %v1030_v11  ;;  %936 = vmatprep.subr.bf16.mxu1 %v1030_v11 }
  0x60   : > { %894 = vmatpush3.bf16.msra.mxu0 %v1030_v11  ;;  %944 = vmatpush3.bf16.msra.mxu1 %v1030_v11 }
  0x61   : > { %895 = vmatprep.subr.bf16.mxu0 %v1031_v12  ;;  %937 = vmatprep.subr.bf16.mxu1 %v1031_v12 }
  0x64   : > { %896 = vmatpush3.bf16.msra.mxu0 %v1031_v12  ;;  %945 = vmatpush3.bf16.msra.mxu1 %v1031_v12 }
  0x65   : > { %897 = vmatprep.subr.bf16.mxu0 %v1032_v13  ;;  %938 = vmatprep.subr.bf16.mxu1 %v1032_v13 }
  0x68   : > { %898 = vmatpush3.bf16.msra.mxu0 %v1032_v13  ;;  %946 = vmatpush3.bf16.msra.mxu1 %v1032_v13 }
  0x6b   : > { %900 = vmatmul.mubr.bf16.vlgmr.msra.gmra.mxu0 %v290_v22  ;;  %916 = vmatmul.mubr.bf16.vlgmr.msra.gmra.mxu1 %v298_v23 }
  0x6c   : > { %903 = vmatprep.mubr.bf16.mxu0 %v291_v24  ;;  %919 = vmatprep.mubr.bf16.mxu1 %v299_v25 }
  0x73   : > { %904 = vmatmul.mubr.bf16.gmra.mxu0 %v292_v34  ;;  %920 = vmatmul.mubr.bf16.gmra.mxu1 %v300_v35 }
  0x74   : > { %907 = vmatprep.mubr.bf16.mxu0 %v293_v36  ;;  %923 = vmatprep.mubr.bf16.mxu1 %v301_v37 }
  0x7b   : > { %908 = vmatmul.mubr.bf16.gmra.mxu0 %v294_v46  ;;  %924 = vmatmul.mubr.bf16.gmra.mxu1 %v302_v47 }
  0x7c   : > { %911 = vmatprep.mubr.bf16.mxu0 %v295_v48  ;;  %927 = vmatprep.mubr.bf16.mxu1 %v303_v49 }
  0x83   : > { %912 = vmatmul.mubr.bf16.gmra.mxu0 %v296_v54  ;;  %928 = vmatmul.mubr.bf16.gmra.mxu1 %v304_v55 }
 0x12b   : > { %v901_v57 = vpop.f32.mrf.mxu0  ;;  %v917_v58 = vpop.f32.mrf.mxu1 }
 0x12c   : > { %v1422_v59 = vadd.f32 %v901_v57, %v1419_v56  ;;  %v1425_v60 = vadd.f32 %v917_v58, %v1419_v56 }
 0x12d   : > { %v410_v61 = vpop.f32.mrf.mxu0  ;;  %v474_v62 = vpop.f32.mrf.mxu1 }
 0x12e   : > { %539 = vst [vmem:[%s1429_s29 + $0x10] sm:$0xff] %v1422_v59  ;;  %555 = vst [vmem:[%s1429_s29 + $0x90] sm:$0xff] %v1425_v60  ;;  %v1436_v63 = vadd.f32 %v1419_v56, %v410_v61  ;;  %v1439_v0 = vadd.f32 %v1419_v56, %v474_v62 }
 0x12f   : > { %v902_v1 = vpop.f32.mrf.mxu0  ;;  %v918_v2 = vpop.f32.mrf.mxu1 }
 0x130   : > { %537 = vst [vmem:[%s1429_s29] sm:$0xff] %v1436_v63  ;;  %553 = vst [vmem:[%s1429_s29 + $0x80] sm:$0xff] %v1439_v0  ;;  %v1446_v3 = vadd.f32 %v902_v1, %v1419_v56  ;;  %v1449_v4 = vadd.f32 %v918_v2, %v1419_v56 }
 0x131   : > { %v413_v5 = vpop.f32.mrf.mxu0  ;;  %v477_v6 = vpop.f32.mrf.mxu1 }
 0x132   : > { %540 = vst [vmem:[%s1429_s29 + $0x18] sm:$0xff] %v1446_v3  ;;  %556 = vst [vmem:[%s1429_s29 + $0x98] sm:$0xff] %v1449_v4  ;;  %v1456_v7 = vadd.f32 %v1419_v56, %v413_v5  ;;  %v1459_v8 = vadd.f32 %v1419_v56, %v477_v6 }
 0x133   : > { %v905_v9 = vpop.f32.mrf.mxu0  ;;  %v921_v10 = vpop.f32.mrf.mxu1 }
 0x134   : > { %538 = vst [vmem:[%s1429_s29 + $0x8] sm:$0xff] %v1456_v7  ;;  %554 = vst [vmem:[%s1429_s29 + $0x88] sm:$0xff] %v1459_v8  ;;  %v1466_v11 = vadd.f32 %v905_v9, %v1419_v56  ;;  %v1469_v12 = vadd.f32 %v921_v10, %v1419_v56 }
 0x135   : > { %v426_v13 = vpop.f32.mrf.mxu0  ;;  %v490_v14 = vpop.f32.mrf.mxu1 }
 0x136   : > { %543 = vst [vmem:[%s1429_s29 + $0x30] sm:$0xff] %v1466_v11  ;;  %559 = vst [vmem:[%s1429_s29 + $0xb0] sm:$0xff] %v1469_v12  ;;  %v1476_v15 = vadd.f32 %v1419_v56, %v426_v13  ;;  %v1479_v16 = vadd.f32 %v1419_v56, %v490_v14 }
 0x137   : > { %v906_v17 = vpop.f32.mrf.mxu0  ;;  %v922_v18 = vpop.f32.mrf.mxu1 }
 0x138   : > { %541 = vst [vmem:[%s1429_s29 + $0x20] sm:$0xff] %v1476_v15  ;;  %557 = vst [vmem:[%s1429_s29 + $0xa0] sm:$0xff] %v1479_v16  ;;  %v1486_v19 = vadd.f32 %v906_v17, %v1419_v56  ;;  %v1489_v20 = vadd.f32 %v922_v18, %v1419_v56 }
 0x139   : > { %v429_v21 = vpop.f32.mrf.mxu0  ;;  %v493_v22 = vpop.f32.mrf.mxu1 }
 0x13a   : > { %544 = vst [vmem:[%s1429_s29 + $0x38] sm:$0xff] %v1486_v19  ;;  %560 = vst [vmem:[%s1429_s29 + $0xb8] sm:$0xff] %v1489_v20  ;;  %v1496_v23 = vadd.f32 %v1419_v56, %v429_v21  ;;  %v1499_v24 = vadd.f32 %v1419_v56, %v493_v22 }
 0x13b   : > { %v909_v25 = vpop.f32.mrf.mxu0  ;;  %v925_v26 = vpop.f32.mrf.mxu1 }
 0x13c   : > { %542 = vst [vmem:[%s1429_s29 + $0x28] sm:$0xff] %v1496_v23  ;;  %558 = vst [vmem:[%s1429_s29 + $0xa8] sm:$0xff] %v1499_v24  ;;  %v1506_v27 = vadd.f32 %v909_v25, %v1419_v56  ;;  %v1509_v28 = vadd.f32 %v925_v26, %v1419_v56 }
 0x13d   : > { %v442_v29 = vpop.f32.mrf.mxu0  ;;  %v506_v30 = vpop.f32.mrf.mxu1 }
 0x13e   : > { %547 = vst [vmem:[%s1429_s29 + $0x50] sm:$0xff] %v1506_v27  ;;  %563 = vst [vmem:[%s1429_s29 + $0xd0] sm:$0xff] %v1509_v28  ;;  %v1516_v31 = vadd.f32 %v1419_v56, %v442_v29  ;;  %v1519_v32 = vadd.f32 %v1419_v56, %v506_v30 }
 0x13f   : > { %v910_v33 = vpop.f32.mrf.mxu0  ;;  %v926_v34 = vpop.f32.mrf.mxu1 }
 0x140   : > { %545 = vst [vmem:[%s1429_s29 + $0x40] sm:$0xff] %v1516_v31  ;;  %561 = vst [vmem:[%s1429_s29 + $0xc0] sm:$0xff] %v1519_v32  ;;  %v1526_v35 = vadd.f32 %v910_v33, %v1419_v56  ;;  %v1529_v36 = vadd.f32 %v926_v34, %v1419_v56 }
 0x141   : > { %v445_v37 = vpop.f32.mrf.mxu0  ;;  %v509_v38 = vpop.f32.mrf.mxu1 }
 0x142   : > { %548 = vst [vmem:[%s1429_s29 + $0x58] sm:$0xff] %v1526_v35  ;;  %564 = vst [vmem:[%s1429_s29 + $0xd8] sm:$0xff] %v1529_v36  ;;  %v1536_v39 = vadd.f32 %v1419_v56, %v445_v37  ;;  %v1539_v40 = vadd.f32 %v1419_v56, %v509_v38 }
 0x143   : > { %v913_v41 = vpop.f32.mrf.mxu0  ;;  %v929_v42 = vpop.f32.mrf.mxu1 }
 0x144   : > { %546 = vst [vmem:[%s1429_s29 + $0x48] sm:$0xff] %v1536_v39  ;;  %562 = vst [vmem:[%s1429_s29 + $0xc8] sm:$0xff] %v1539_v40  ;;  %v1546_v43 = vadd.f32 %v913_v41, %v1419_v56  ;;  %v1549_v44 = vadd.f32 %v929_v42, %v1419_v56 }
 0x145   : > { %v458_v45 = vpop.f32.mrf.mxu0  ;;  %v522_v46 = vpop.f32.mrf.mxu1 }
 0x146   : > { %551 = vst [vmem:[%s1429_s29 + $0x70] sm:$0xff] %v1546_v43  ;;  %567 = vst [vmem:[%s1429_s29 + $0xf0] sm:$0xff] %v1549_v44  ;;  %v1556_v47 = vadd.f32 %v1419_v56, %v458_v45  ;;  %v1559_v48 = vadd.f32 %v1419_v56, %v522_v46 }
 0x147   : > { %v914_v49 = vpop.f32.mrf.mxu0  ;;  %v930_v50 = vpop.f32.mrf.mxu1 }
 0x148   : > { %549 = vst [vmem:[%s1429_s29 + $0x60] sm:$0xff] %v1556_v47  ;;  %565 = vst [vmem:[%s1429_s29 + $0xe0] sm:$0xff] %v1559_v48  ;;  %v1566_v51 = vadd.f32 %v914_v49, %v1419_v56  ;;  %v1569_v52 = vadd.f32 %v930_v50, %v1419_v56  ;;  %572 = sbr.rel (%p1772_p3) target bundleno = 335 (0x14f), region = 44 }
 0x149   : > { %v461_v53 = vpop.f32.mrf.mxu0  ;;  %v525_v54 = vpop.f32.mrf.mxu1 }
 0x14a   : > { %552 = vst [vmem:[%s1429_s29 + $0x78] sm:$0xff] %v1566_v51  ;;  %568 = vst [vmem:[%s1429_s29 + $0xf8] sm:$0xff] %v1569_v52  ;;  %v1576_v55 = vadd.f32 %v1419_v56, %v461_v53  ;;  %v1579_v57 = vadd.f32 %v1419_v56, %v525_v54 }
 0x14c   : > { %550 = vst [vmem:[%s1429_s29 + $0x68] sm:$0xff] %v1576_v55  ;;  %566 = vst [vmem:[%s1429_s29 + $0xe8] sm:$0xff] %v1579_v57 }
 0x14d   : > { %v1215_v58 = vmov 0.0  }
 0x14e   : > { %573 = vst [vmem:[#allocation8] sm:$0x1] %v1215_v58  ;;  %574 = vst [vmem:[#allocation10] sm:$0x1] %v1215_v58 }
 0x14f PF: > { %v576_v61 = vadd.f32 %v1456_v7, %v1436_v63  ;;  %s858_s6 = sshll.u32 %s1272_s22, 12  ;;  %s701_s23 = sshll.u32 %s1429_s29, 4  ;;  %v616_v1 = vmul.f32 %v1436_v63, %v1436_v63  ;;  %v617_v2 = vmul.f32 %v1456_v7, %v1456_v7  ;;  %s1598_s23 = int_to_ptr.vmem [resolvable:$true] %s701_s23 }
 0x150   : > { %s1594_s15 = scalar_lea.hbm %s1754_s3, %s858_s6  ;;  %s688_s27 = scalar_lea.sflag [#allocation4], %s1368_s11 }
 0x151   : > { %v577_v56 = vadd.f32 %v576_v61, %v1422_v59  ;;  %s1087_s28 = scalar_lea.vmem %s1598_s23, 4096  ;;  %p1773_p7 = scmp.ne.s32.totalorder %s1766_s14, 0 }
 0x152   : > { %p1088_p12 = scmp.ne.s32.totalorder %s1598_s23, %s1087_s28  ;;  %s1216_s9 = smov [#allocation7]  }
 0x153   : > { %v578_v62 = vadd.f32 %v577_v56, %v1446_v3  ;;  %s1091_s10 = sshll.u32 %s1216_s9, 4  ;;  %s1092_s10 = int_to_ptr.vmem [resolvable:$false] %s1091_s10 }
 0x154   : > { %p1089_p8 = pnand %p1088_p12, %p1773_p7  ;;  %s1093_s12 = scalar_lea.vmem %s1092_s10, 8192 }
 0x155   : > { %v579_v5 = vadd.f32 %v578_v62, %v1476_v15  ;;  %p1094_p2 = scmp.lt.s32.totalorder %s1598_s23, %s1092_s10  ;;  %p1095_p13 = scmp.lt.s32.totalorder %s1093_s12, %s1087_s28 }
 0x156   : > { %p1090_p11 = pneg %p1089_p8 }
 0x157   : > { %p1096_p0 = por %p1095_p13, %p1094_p2 }
 0x159   : > { %p1097_p5 = pnand %p1096_p0, %p1090_p11 }
 0x15b   : > { %1100 = shalt.err (!%p1097_p5)
}
 0x15c   : > { %s1101_s16 = scalar_lea.hbm %s1594_s15, 4096  ;;  %s1105_s26 = scalar_lea.hbm %s1754_s3, 8192 }
 0x15d   : > { %p1102_p10 = scmp.ne.s32.totalorder %s1594_s15, %s1101_s16  ;;  %p1106_p6 = scmp.lt.s32.totalorder %s1594_s15, %s1754_s3 }
 0x15e   : > { %p1107_p9 = scmp.lt.s32.totalorder %s1105_s26, %s1101_s16 }
 0x15f   : > { %p1103_p1 = pnand %p1102_p10, %p1773_p7 }
 0x160   : > { %p1108_p3 = por %p1107_p9, %p1106_p6 }
 0x161   : > { %p1104_p4 = pneg %p1103_p1 }
 0x163   : > { %p1109_p12 = pnand %p1108_p3, %p1104_p4 }
 0x165   : > { %1112 = shalt.err (!%p1109_p12)
}
 0x166   : > { %s1217_s7 = smov 128   ;;  %s1218_s8 = smov 8   ;;  %v618_v63 = vmul.f32 %v1422_v59, %v1422_v59  ;;  %v580_v6 = vadd.f32 %v579_v5, %v1496_v23  ;;  %v619_v7 = vmul.f32 %v1446_v3, %v1446_v3  ;;  %v648_v9 = vadd.f32 %v617_v2, %v616_v1 }
 0x167   : > { %953 = dma.vmem_to_hbm [thread:$0]  (%p1773_p7), %s1598_s23, 4096, %s1594_s15, %s688_s27, %s1217_s7, %s1217_s7, %s1218_s8   ;;  %v620_v13 = vmul.f32 %v1476_v15, %v1476_v15  ;;  %v621_v18 = vmul.f32 %v1496_v23, %v1496_v23  ;;  %v622_v22 = vmul.f32 %v1466_v11, %v1466_v11  ;;  %v623_v26 = vmul.f32 %v1486_v19, %v1486_v19 }
 0x168   : > { %v581_v10 = vadd.f32 %v580_v6, %v1466_v11  ;;  %v649_v14 = vadd.f32 %v648_v9, %v618_v63  ;;  %v624_v30 = vmul.f32 %v1516_v31, %v1516_v31  ;;  %v625_v34 = vmul.f32 %v1536_v39, %v1536_v39  ;;  %s1219_s14 = smov [#allocation8]   ;;  %p1774_p8 = scmp.eq.s32.totalorder %s1272_s22, 1 }
 0x169   : > { %v626_v38 = vmul.f32 %v1506_v27, %v1506_v27  ;;  %v627_v42 = vmul.f32 %v1526_v35, %v1526_v35  ;;  %v628_v46 = vmul.f32 %v1556_v47, %v1556_v47  ;;  %v629_v50 = vmul.f32 %v1576_v55, %v1576_v55  ;;  %s715_s11 = sshll.u32 %s1219_s14, 4  ;;  %s716_s11 = int_to_ptr.vmem [resolvable:$true] %s715_s11 }
 0x16a   : > { %v582_v17 = vadd.f32 %v581_v10, %v1486_v19  ;;  %v650_v21 = vadd.f32 %v649_v14, %v619_v7  ;;  %v630_v54 = vmul.f32 %v1546_v43, %v1546_v43  ;;  %v631_v61 = vmul.f32 %v1566_v51, %v1566_v51  ;;  %s1113_s15 = scalar_lea.vmem %s716_s11, 16  ;;  %s1119_s23 = scalar_lea.vmem %s716_s11, 32 }
 0x16b   : > { %v632_v62 = vmul.f32 %v1439_v0, %v1439_v0  ;;  %v633_v2 = vmul.f32 %v1459_v8, %v1459_v8  ;;  %v634_v63 = vmul.f32 %v1425_v60, %v1425_v60  ;;  %v635_v7 = vmul.f32 %v1449_v4, %v1449_v4  ;;  %p1114_p7 = scmp.ne.s32.totalorder %s716_s11, %s1113_s15  ;;  %p1120_p13 = scmp.lt.s32.totalorder %s716_s11, %s716_s11 }
 0x16c   : > { %v583_v59 = vadd.f32 %v582_v17, %v1516_v31  ;;  %v651_v25 = vadd.f32 %v650_v21, %v620_v13  ;;  %v636_v10 = vmul.f32 %v1479_v16, %v1479_v16  ;;  %v637_v14 = vmul.f32 %v1499_v24, %v1499_v24  ;;  %p1121_p0 = scmp.lt.s32.totalorder %s1119_s23, %s1113_s15 }
 0x16d   : > { %p1115_p11 = pnand %p1114_p7, %p1774_p8 }
 0x16e   : > { %v584_v3 = vadd.f32 %v583_v59, %v1536_v39  ;;  %v652_v29 = vadd.f32 %v651_v25, %v621_v18  ;;  %v638_v18 = vmul.f32 %v1469_v12, %v1469_v12  ;;  %v639_v59 = vmul.f32 %v1489_v20, %v1489_v20  ;;  %p1122_p5 = por %p1121_p0, %p1120_p13 }
 0x16f   : > { %v640_v25 = vmul.f32 %v1519_v32, %v1519_v32  ;;  %p1116_p2 = pneg %p1115_p11 }
 0x170   : > { %v585_v15 = vadd.f32 %v584_v3, %v1506_v27  ;;  %v653_v33 = vadd.f32 %v652_v29, %v622_v22 }
 0x171   : > { %p1123_p10 = pnand %p1122_p5, %p1116_p2 }
 0x172   : > { %v586_v23 = vadd.f32 %v585_v15, %v1526_v35  ;;  %v654_v37 = vadd.f32 %v653_v33, %v623_v26  ;;  %v641_v26 = vmul.f32 %v1539_v40, %v1539_v40  ;;  %v642_v15 = vmul.f32 %v1509_v28, %v1509_v28 }
 0x173   : > { %v643_v33 = vmul.f32 %v1529_v36, %v1529_v36 }
 0x174   : > { %v587_v11 = vadd.f32 %v586_v23, %v1556_v47  ;;  %v655_v41 = vadd.f32 %v654_v37, %v624_v30 }
 0x176   : > { %v588_v19 = vadd.f32 %v587_v11, %v1576_v55  ;;  %v656_v45 = vadd.f32 %v655_v41, %v625_v34  ;;  %v644_v34 = vmul.f32 %v1559_v48, %v1559_v48  ;;  %v645_v11 = vmul.f32 %v1579_v57, %v1579_v57 }
 0x177   : > { %v646_v41 = vmul.f32 %v1549_v44, %v1549_v44 }
 0x178   : > { %v589_v31 = vadd.f32 %v588_v19, %v1546_v43  ;;  %v657_v49 = vadd.f32 %v656_v45, %v626_v38 }
 0x17a   : > { %v590_v39 = vadd.f32 %v589_v31, %v1566_v51  ;;  %v658_v53 = vadd.f32 %v657_v49, %v627_v42 }
 0x17c   : > { %v591_v27 = vadd.f32 %v590_v39, %v1439_v0  ;;  %v659_v58 = vadd.f32 %v658_v53, %v628_v46 }
 0x17e   : > { %v592_v35 = vadd.f32 %v591_v27, %v1459_v8  ;;  %v660_v56 = vadd.f32 %v659_v58, %v629_v50  ;;  %v575_v50 = vld [vmem:[#allocation8] sm:$0x1] }
 0x180   : > { %v593_v47 = vadd.f32 %v592_v35, %v1425_v60  ;;  %v661_v1 = vadd.f32 %v660_v56, %v630_v54 }
 0x182   : > { %v594_v55 = vadd.f32 %v593_v47, %v1449_v4  ;;  %v662_v5 = vadd.f32 %v661_v1, %v631_v61 }
 0x184   : > { %v595_v43 = vadd.f32 %v594_v55, %v1479_v16  ;;  %v663_v6 = vadd.f32 %v662_v5, %v632_v62 }
 0x186   : > { %v596_v51 = vadd.f32 %v595_v43, %v1499_v24  ;;  %v664_v9 = vadd.f32 %v663_v6, %v633_v2 }
 0x188   : > { %v597_v0 = vadd.f32 %v596_v51, %v1469_v12  ;;  %v665_v13 = vadd.f32 %v664_v9, %v634_v63 }
 0x18a   : > { %v598_v8 = vadd.f32 %v597_v0, %v1489_v20  ;;  %v666_v17 = vadd.f32 %v665_v13, %v635_v7 }
 0x18c   : > { %v599_v60 = vadd.f32 %v598_v8, %v1519_v32  ;;  %v667_v21 = vadd.f32 %v666_v17, %v636_v10 }
 0x18e   : > { %v600_v4 = vadd.f32 %v599_v60, %v1539_v40  ;;  %v668_v22 = vadd.f32 %v667_v21, %v637_v14 }
 0x190   : > { %v601_v16 = vadd.f32 %v600_v4, %v1509_v28  ;;  %v669_v3 = vadd.f32 %v668_v22, %v638_v18 }
 0x192   : > { %v602_v24 = vadd.f32 %v601_v16, %v1529_v36  ;;  %v670_v29 = vadd.f32 %v669_v3, %v639_v59  ;;  %v647_v36 = vmul.f32 %v1569_v52, %v1569_v52 }
 0x194   : > { %v603_v12 = vadd.f32 %v602_v24, %v1559_v48  ;;  %v671_v30 = vadd.f32 %v670_v29, %v640_v25 }
 0x196   : > { %v604_v20 = vadd.f32 %v603_v12, %v1579_v57  ;;  %v672_v23 = vadd.f32 %v671_v30, %v641_v26 }
 0x198   : > { %v605_v32 = vadd.f32 %v604_v20, %v1549_v44  ;;  %v673_v37 = vadd.f32 %v672_v23, %v642_v15 }
 0x19a   : > { %v606_v40 = vadd.f32 %v605_v32, %v1569_v52  ;;  %v674_v38 = vadd.f32 %v673_v37, %v643_v33 }
 0x19c   : > { %v607_v28 = vrot.slane %v606_v40, 4  ;;  %v675_v19 = vadd.f32 %v674_v38, %v644_v34 }
 0x19e   : > { %v608_v42 = vadd.f32 %v607_v28, %v606_v40  ;;  %v676_v45 = vadd.f32 %v675_v19, %v645_v11 }
 0x1a0   : > { %v609_v31 = vrot.slane %v608_v42, 2  ;;  %v677_v46 = vadd.f32 %v676_v45, %v646_v41 }
 0x1a2   : > { %v610_v48 = vadd.f32 %v609_v31, %v608_v42  ;;  %v678_v49 = vadd.f32 %v677_v46, %v647_v36 }
 0x1a4   : > { %v611_v39 = vrot.slane %v610_v48, 1  ;;  %v679_v53 = vrot.slane %v678_v49, 4 }
 0x1a6   : > { %v612_v57 = vadd.f32 %v611_v39, %v610_v48  ;;  %v680_v27 = vadd.f32 %v679_v53, %v678_v49 }
 0x1a8   : > { %v613_v54 = vadd.f32 %v612_v57, %v575_v50  ;;  %v681_v44 = vrot.slane %v680_v27, 2 }
 0x1aa   : > { %614 = vst [vmem:[#allocation8] sm:$0x1] %v613_v54  ;;  %v682_v58 = vadd.f32 %v681_v44, %v680_v27 }
 0x1ab   : > { %1126 = shalt.err (!%p1123_p10)
}
 0x1ac   : > { %p1775_p1 = pmov %p1774_p8  ;;  %v683_v52 = vrot.slane %v682_v58, 1  ;;  %v615_v35 = vld [vmem:[#allocation10] sm:$0x1]  ;;  %s1220_s9 = smov [#allocation10]  }
 0x1ad   : > { %s726_s10 = sshll.u32 %s1220_s9, 4  ;;  %s727_s10 = int_to_ptr.vmem [resolvable:$true] %s726_s10 }
 0x1ae   : > { %955 = dma.vmem_to_hbm [thread:$0]  (%p1775_p1), %s716_s11, 16, %s1755_s4, [#allocation9]   ;;  %v684_v61 = vadd.f32 %v683_v52, %v682_v58 }
 0x1af   : > { %s1137_s12 = scalar_lea.vmem %s727_s10, 16  ;;  %p1776_p6 = pmov %p1775_p1 }
 0x1b0   : > { %v685_v56 = vadd.f32 %v684_v61, %v615_v35  ;;  %p1138_p4 = scmp.ne.s32.totalorder %s727_s10, %s1137_s12  ;;  %s1143_s16 = scalar_lea.vmem %s727_s10, 32 }
 0x1b1   : > { %p1144_p12 = scmp.lt.s32.totalorder %s727_s10, %s727_s10  ;;  %p1145_p7 = scmp.lt.s32.totalorder %s1143_s16, %s1137_s12 }
 0x1b2   : > { %686 = vst [vmem:[#allocation10] sm:$0x1] %v685_v56  ;;  %p1139_p9 = pnand %p1138_p4, %p1776_p6 }
 0x1b3   : > { %p1146_p8 = por %p1145_p7, %p1144_p12 }
 0x1b4   : > { %p1140_p3 = pneg %p1139_p9 }
 0x1b6   : > { %p1147_p11 = pnand %p1146_p8, %p1140_p3 }
 0x1b8   : > { %1150 = shalt.err (!%p1147_p11)
}
 0x1b9   : > { %p1777_p2 = pmov %p1775_p1  ;;  %p1778_p13 = pmov %p1775_p1 }
 0x1bb   : > { %957 = dma.vmem_to_hbm [thread:$0]  (%p1777_p2), %s727_s10, 16, %s1756_s5, [#allocation9]  }
 0x1bc   : > { %1186 = dma.done.wait (%p1778_p13), [#allocation9], 32   ;;  %p1779_p0 = pmov %p1775_p1 }
 0x1be   : > { %1188 = vsyncadd (%p1779_p0), [#allocation9], 4294967264 }
 0x1bf PF: > { %s746_s26 = sand.u32 1, %s1195_s18   ;;  %p1780_p5 = scmp.ne.s32.totalorder %s1762_s25, 0 }
 0x1c0   : > { %p1781_p10 = scmp.ge.s32.totalorder %s1207_s21, 2  ;;  %s747_s29 = scalar_lea.sflag [#allocation4], %s746_s26 }
 0x1c2   : > { %p972_p1 = pnand %p1781_p10, %p1780_p5 }
 0x1c4   : > { %p973_p4 = pneg %p972_p1 }
 0x1c6   : > { %1190 = dma.done.wait (%p973_p4), %s747_s29, 4096  }
 0x1c7   : > { %1192 = vsyncadd (%p973_p4), %s747_s29, 4294963200  ;;  %p21_p6 = scmp.ge.s32.totalorder %s1306_s30, 4   ;;  %s1782_s18 = smov %s1199_s19 }
 0x1c8   : > { %s1783_s19 = smov %s1203_s20  ;;  %s1784_s20 = smov %s1323_s13 }
 0x1c9   : > { %s1785_s21 = smov %s1306_s30  ;;  %23 = sbr.rel (!%p21_p6) target bundleno = 7 (0x7), region = 101 }
 0x1ce   :  { %752 = vsyncpa [#allocation3], 1 }
 0x1cf   :  { %754 = vsyncpa [#allocation3 + $0x1], 1 }
 0x1d0   :  { %755 = vsyncpa [#allocation6], 1 }
 0x1d1   :  { %756 = vsyncpa [#allocation4], 1 }
 0x1d2   :  { %758 = vsyncpa [#allocation4 + $0x1], 1 }
 0x1d3   :  { %759 = vsyncpa [#allocation9], 1 }

</bundles_post_ra>
